<compile_context>
chip_gen: v5e
topology: v5e:2x2
jax: 0.10.0
libtpu: 0.0.40
codegen_flags: <defaults>
</compile_context>

<pallas_src>
import functools
import numpy as np

import jax
import jax.numpy as jnp
from jax import lax
from jax.experimental import pallas as pl
from jax.experimental.pallas import tpu as pltpu


# ----------------------------------------------------------------------------
# Adaptive-average-pool row matrix (exact nn.AdaptiveAvgPool2d bin semantics).
# ----------------------------------------------------------------------------
@functools.lru_cache(maxsize=None)
def _adaptive_pool_matrix_np(in_len: int, out_len: int):
    m = np.zeros((out_len, in_len), dtype=np.float32)
    for i in range(out_len):
        start = (i * in_len) // out_len
        end = -(-((i + 1) * in_len) // out_len)  # ceil
        m[i, start:end] = 1.0 / (end - start)
    return m


def _adaptive_pool_matrix_f32(in_len: int, out_len: int):
    return jnp.asarray(_adaptive_pool_matrix_np(in_len, out_len), jnp.float32)


@functools.lru_cache(maxsize=None)
def _pool_matrix_scaled_bf16(in_len: int, out_len: int, kgrp: int):
    # 1/k (mean over the k axis) folded into the pooling matrix.
    m = _adaptive_pool_matrix_np(in_len, out_len) * (1.0 / kgrp)
    return jnp.asarray(m, jnp.bfloat16)


# ----------------------------------------------------------------------------
# Kernel
# ----------------------------------------------------------------------------
def _cap_attn_kernel(q_ref, kv_ref, wqk_ref, bqk_ref, wv_ref, bv_ref, m_ref,
                     o_ref, qk_sc, acc_ref):
    ki = pl.program_id(1)
    nk = pl.num_programs(1)

    @pl.when(ki == 0)
    def _():
        acc_ref[...] = jnp.zeros_like(acc_ref)
        # Fused q-side projection (Wq, scale and Wk^T pre-composed on host).
        # Depends only on the batch index -> computed once per batch, cached.
        qk = jnp.dot(q_ref[0].astype(jnp.bfloat16), wqk_ref[...],
                     preferred_element_type=jnp.float32) + bqk_ref[...]
        qk_sc[...] = qk.astype(jnp.bfloat16)

    kv = kv_ref[0, 0].astype(jnp.bfloat16)                        # (s, dim)

    # scores = (q/sqrt(dim)) @ K^T with K = kv@Wk (+bk, softmax-invariant).
    scores = lax.dot_general(qk_sc[...], kv,
                             (((1,), (1,)), ((), ())),
                             preferred_element_type=jnp.float32)  # (sq, s)

    # Softmax in f32 (v5e-safe); normalization via EUP approx reciprocal.
    scores = scores - jnp.max(scores, axis=-1, keepdims=True)
    e = jnp.exp(scores)
    inv_l = pl.reciprocal(jnp.sum(e, axis=-1, keepdims=True), approx=True)
    probs = (e * inv_l).astype(jnp.bfloat16)                      # (sq, s)

    # Re-associated pooling:  (M/k @ probs) @ kv   -- V projection deferred.
    pooled_p = jnp.dot(m_ref[...], probs,
                       preferred_element_type=jnp.float32)        # (P, s)
    acc_ref[...] += jnp.dot(pooled_p.astype(jnp.bfloat16), kv,
                            preferred_element_type=jnp.float32)   # (P, dim)

    @pl.when(ki == nk - 1)
    def _():
        # Apply the V projection once per batch on the tiny pooled accumulator.
        out = jnp.dot(acc_ref[...].astype(jnp.bfloat16), wv_ref[...],
                      preferred_element_type=jnp.float32) + bv_ref[...]
        o_ref[0] = out.astype(o_ref.dtype)


def cap_attention_pallas(query, key_value, wqk_bf16, bqk, wv_bf16, bv,
                         prompt_length):
    b, kgrp, s, dim = key_value.shape
    sq = query.shape[1]
    pool_m = _pool_matrix_scaled_bf16(sq, prompt_length, kgrp)

    return pl.pallas_call(
        _cap_attn_kernel,
        out_shape=jax.ShapeDtypeStruct((b, prompt_length, dim), query.dtype),
        grid_spec=pltpu.PrefetchScalarGridSpec(
            num_scalar_prefetch=0,
            grid=(b, kgrp),
            in_specs=[
                pl.BlockSpec((1, sq, dim), lambda bi, ki: (bi, 0, 0)),        # query
                pl.BlockSpec((1, 1, s, dim), lambda bi, ki: (bi, ki, 0, 0)),  # key_value
                pl.BlockSpec((dim, dim), lambda bi, ki: (0, 0)),              # Wqk = scale*Wq@Wk^T (bf16)
                pl.BlockSpec((1, dim), lambda bi, ki: (0, 0)),                # bqk (f32)
                pl.BlockSpec((dim, dim), lambda bi, ki: (0, 0)),              # Wv (bf16)
                pl.BlockSpec((1, dim), lambda bi, ki: (0, 0)),                # bv (f32)
                pl.BlockSpec((prompt_length, sq), lambda bi, ki: (0, 0)),     # pooling matrix / k (bf16)
            ],
            out_specs=pl.BlockSpec((1, prompt_length, dim),
                                   lambda bi, ki: (bi, 0, 0)),
            scratch_shapes=[
                pltpu.VMEM((sq, dim), jnp.bfloat16),            # cached fused q projection
                pltpu.VMEM((prompt_length, dim), jnp.float32),  # k-axis accumulator
            ],
        ),
        compiler_params=pltpu.CompilerParams(
            dimension_semantics=("parallel", "arbitrary")),
    )(query, key_value, wqk_bf16, bqk, wv_bf16, bv, pool_m)


# ----------------------------------------------------------------------------
# Module wrapper (deterministic synthetic init) + pure-JAX reference
# ----------------------------------------------------------------------------
class CAPPallas:
    """JAX/Pallas port of the PyTorch CAP module."""

    def __init__(self, prompt_length, dim=768, key=jax.random.PRNGKey(0)):
        self.prompt_length = prompt_length
        self.dim = dim
        ks = jax.random.split(key, 6)
        init = 0.02
        # Raw f32 parameters (used by the pure-JAX reference).  Stored already
        # transposed so both kernel and reference compute x @ W + b
        # (equivalent to PyTorch's x @ W_pt.T + b).
        self.wq = init * jax.random.normal(ks[0], (dim, dim), jnp.float32)
        self.wk = init * jax.random.normal(ks[1], (dim, dim), jnp.float32)
        self.wv = init * jax.random.normal(ks[2], (dim, dim), jnp.float32)
        self.bq = init * jax.random.normal(ks[3], (1, dim), jnp.float32)
        self.bk = init * jax.random.normal(ks[4], (1, dim), jnp.float32)
        self.bv = init * jax.random.normal(ks[5], (1, dim), jnp.float32)
        # Kernel-side parameters prepared ONCE on host (f32 compose, bf16 ship):
        #   Wqk = scale * Wq @ Wk^T,  bqk = scale * bq @ Wk^T
        # (bk cancels under softmax: constant along the softmax axis).
        scale = 1.0 / float(dim) ** 0.5
        self.wqk_k = ((self.wq @ self.wk.T) * scale).astype(jnp.bfloat16)
        self.bqk_k = (self.bq @ self.wk.T) * scale
        self.wv_k = self.wv.astype(jnp.bfloat16)
        self.bv_k = self.bv

    def _attention(self, query, key_value):
        return cap_attention_pallas(query, key_value,
                                    self.wqk_k, self.bqk_k,
                                    self.wv_k, self.bv_k,
                                    self.prompt_length)

    def __call__(self, V, T, r_i, r_t):
        V_to_V = self._attention(V, r_i)
        T_to_T = self._attention(T, r_t)
        return T_to_T, V_to_V

    # ---- pure-JAX f32 reference (mirrors the PyTorch forward) ----
    def reference_attention(self, query, key_value):
        b, kgrp, s, dim = key_value.shape
        q = query @ self.wq + self.bq[0]
        q = jnp.broadcast_to(q[:, None], (b, kgrp, q.shape[1], dim))
        k = key_value @ self.wk + self.bk[0]
        v = key_value @ self.wv + self.bv[0]
        scores = jnp.einsum('bkqd,bksd->bkqs', q, k) / dim ** 0.5
        probs = jax.nn.softmax(scores, axis=-1)
        out = jnp.einsum('bkqs,bksd->bkqd', probs, v)
        m = _adaptive_pool_matrix_f32(out.shape[2], self.prompt_length)
        pooled = jnp.einsum('pq,bkqd->bkpd', m, out)
        return pooled.mean(axis=1)

    def reference(self, V, T, r_i, r_t):
        return self.reference_attention(T, r_t), self.reference_attention(V, r_i)


if __name__ == "__main__":
    key = jax.random.PRNGKey(0)
    k_mod, k_v, k_t, k_ri, k_rt = jax.random.split(key, 5)

    # Small shapes consistent with the module's forward; dim chosen lane-dense
    # (multiple of 128).
    b, kgrp, dim, prompt_length = 2, 3, 128, 4
    sq_v, s_i = 16, 24   # V: (b, sq_v, dim), r_i: (b, k, s_i, dim)
    sq_t, s_t = 8, 12    # T: (b, sq_t, dim), r_t: (b, k, s_t, dim)

    V = jax.random.normal(k_v, (b, sq_v, dim), jnp.float32)
    T = jax.random.normal(k_t, (b, sq_t, dim), jnp.float32)
    r_i = jax.random.normal(k_ri, (b, kgrp, s_i, dim), jnp.float32)
    r_t = jax.random.normal(k_rt, (b, kgrp, s_t, dim), jnp.float32)

    cap = CAPPallas(prompt_length=prompt_length, dim=dim, key=k_mod)

    T_to_T, V_to_V = cap(V, T, r_i, r_t)
    jax.block_until_ready((T_to_T, V_to_V))

    # Tolerances relaxed for bf16 MXU inputs + approx reciprocal.
    T_ref, V_ref = cap.reference(V, T, r_i, r_t)
    np.testing.assert_allclose(np.asarray(T_to_T), np.asarray(T_ref),
                               rtol=2e-2, atol=1e-2)
    np.testing.assert_allclose(np.asarray(V_to_V), np.asarray(V_ref),
                               rtol=2e-2, atol=1e-2)

    print("KERNEL_OK")
</pallas_src>

<mosaic_0001>
module attributes {stable_mosaic.version = 11 : i64} {
  func.func @_cap_attn_kernel(%arg0: i32, %arg1: i32, %arg2: memref<1x16x128xf32, #tpu.memory_space<vmem>>, %arg3: memref<1x1x24x128xf32, #tpu.memory_space<vmem>>, %arg4: memref<128x128xbf16, #tpu.memory_space<vmem>>, %arg5: memref<1x128xf32, #tpu.memory_space<vmem>>, %arg6: memref<128x128xbf16, #tpu.memory_space<vmem>>, %arg7: memref<1x128xf32, #tpu.memory_space<vmem>>, %arg8: memref<4x16xbf16, #tpu.memory_space<vmem>>, %arg9: memref<1x4x128xf32, #tpu.memory_space<vmem>>, %arg10: memref<16x128xbf16, #tpu.memory_space<vmem>>, %arg11: memref<4x128xf32, #tpu.memory_space<vmem>>) attributes {dimension_semantics = [#tpu.dimension_semantics<parallel>, #tpu.dimension_semantics<arbitrary>], iteration_bounds = array<i64: 2, 3>, scalar_prefetch = 0 : i64, scratch_operands = 2 : i64, tpu.core_type = #tpu.core_type<tc>, window_params = [{transform_indices = @transform_0, window_bounds = array<i64: 1, 16, 128>}, {transform_indices = @transform_1, window_bounds = array<i64: 1, 1, 24, 128>}, {pipeline_mode = #tpu.pipeline_mode<synchronous>, transform_indices = @transform_2, window_bounds = array<i64: 128, 128>}, {pipeline_mode = #tpu.pipeline_mode<synchronous>, transform_indices = @transform_3, window_bounds = array<i64: 1, 128>}, {pipeline_mode = #tpu.pipeline_mode<synchronous>, transform_indices = @transform_4, window_bounds = array<i64: 128, 128>}, {pipeline_mode = #tpu.pipeline_mode<synchronous>, transform_indices = @transform_5, window_bounds = array<i64: 1, 128>}, {pipeline_mode = #tpu.pipeline_mode<synchronous>, transform_indices = @transform_6, window_bounds = array<i64: 4, 16>}, {transform_indices = @transform_7, window_bounds = array<i64: 1, 4, 128>}]} {
    %c0_i32 = arith.constant 0 : i32
    %0 = arith.cmpi eq, %arg1, %c0_i32 : i32
    %1 = arith.extui %0 : i1 to i32
    %c0_i32_0 = arith.constant 0 : i32
    %2 = arith.cmpi ne, %1, %c0_i32_0 : i32
    scf.if %2 {
      %cst_17 = arith.constant 0.000000e+00 : f32
      %29 = vector.broadcast %cst_17 : f32 to vector<4x128xf32>
      %c0_18 = arith.constant 0 : index
      %c0_19 = arith.constant 0 : index
      %30 = vector.load %arg11[%c0_18, %c0_19] : memref<4x128xf32, #tpu.memory_space<vmem>>, vector<4x128xf32>
      tpu.vector_store %arg11[%c0_18, %c0_19], %29 {strides = array<i32>} : memref<4x128xf32, #tpu.memory_space<vmem>>, vector<4x128xf32>,
      %c0_20 = arith.constant 0 : index
      %c0_21 = arith.constant 0 : index
      %c0_22 = arith.constant 0 : index
      %31 = vector.load %arg2[%c0_20, %c0_21, %c0_22] : memref<1x16x128xf32, #tpu.memory_space<vmem>>, vector<1x16x128xf32>
      %32 = vector.shape_cast %31 : vector<1x16x128xf32> to vector<16x128xf32>
      %33 = arith.truncf %32 : vector<16x128xf32> to vector<16x128xbf16>
      %c0_23 = arith.constant 0 : index
      %c0_24 = arith.constant 0 : index
      %34 = vector.load %arg4[%c0_23, %c0_24] : memref<128x128xbf16, #tpu.memory_space<vmem>>, vector<128x128xbf16>
      %cst_25 = arith.constant dense<0.000000e+00> : vector<16x128xf32>
      %35 = tpu.matmul %33, %34, %cst_25 {dimension_numbers = #tpu.dot_dimension_numbers<[1], [0], [0], [1], [0, 0, 1, 1], [], []>} : vector<16x128xbf16>, vector<128x128xbf16>, vector<16x128xf32> -> vector<16x128xf32>
      %c0_26 = arith.constant 0 : index
      %c0_27 = arith.constant 0 : index
      %36 = vector.load %arg5[%c0_26, %c0_27] : memref<1x128xf32, #tpu.memory_space<vmem>>, vector<1x128xf32>
      %37 = vector.broadcast %36 : vector<1x128xf32> to vector<16x128xf32>
      %38 = arith.addf %35, %37 : vector<16x128xf32>
      %39 = arith.truncf %38 : vector<16x128xf32> to vector<16x128xbf16>
      %c0_28 = arith.constant 0 : index
      %c0_29 = arith.constant 0 : index
      %40 = vector.load %arg10[%c0_28, %c0_29] : memref<16x128xbf16, #tpu.memory_space<vmem>>, vector<16x128xbf16>
      tpu.vector_store %arg10[%c0_28, %c0_29], %39 {strides = array<i32>} : memref<16x128xbf16, #tpu.memory_space<vmem>>, vector<16x128xbf16>,
    } else {
    }
    %c0 = arith.constant 0 : index
    %c0_1 = arith.constant 0 : index
    %c0_2 = arith.constant 0 : index
    %c0_3 = arith.constant 0 : index
    %3 = vector.load %arg3[%c0, %c0_1, %c0_2, %c0_3] : memref<1x1x24x128xf32, #tpu.memory_space<vmem>>, vector<1x1x24x128xf32>
    %4 = vector.shape_cast %3 : vector<1x1x24x128xf32> to vector<24x128xf32>
    %5 = arith.truncf %4 : vector<24x128xf32> to vector<24x128xbf16>
    %c0_4 = arith.constant 0 : index
    %c0_5 = arith.constant 0 : index
    %6 = vector.load %arg10[%c0_4, %c0_5] : memref<16x128xbf16, #tpu.memory_space<vmem>>, vector<16x128xbf16>
    %cst = arith.constant dense<0.000000e+00> : vector<16x24xf32>
    %7 = tpu.matmul %6, %5, %cst {dimension_numbers = #tpu.dot_dimension_numbers<[1], [1], [0], [0], [0, 0, 1, 0], [], []>} : vector<16x128xbf16>, vector<24x128xbf16>, vector<16x24xf32> -> vector<16x24xf32>
    %cst_6 = arith.constant dense<0xFF800000> : vector<16xf32>
    %8 = vector.multi_reduction <maximumf>, %7, %cst_6 [1] : vector<16x24xf32> to vector<16xf32>
    %9 = vector.shape_cast %8 : vector<16xf32> to vector<16x1xf32>
    %10 = vector.broadcast %9 : vector<16x1xf32> to vector<16x24xf32>
    %11 = arith.subf %7, %10 : vector<16x24xf32>
    %12 = math.exp %11 : vector<16x24xf32>
    %cst_7 = arith.constant dense<0.000000e+00> : vector<16xf32>
    %13 = vector.multi_reduction <add>, %12, %cst_7 [1] : vector<16x24xf32> to vector<16xf32>
    %14 = vector.shape_cast %13 : vector<16xf32> to vector<16x1xf32>
    %15 = tpu.reciprocal %14 {approx = true} : vector<16x1xf32> -> vector<16x1xf32>
    %16 = vector.broadcast %15 : vector<16x1xf32> to vector<16x24xf32>
    %17 = arith.mulf %12, %16 : vector<16x24xf32>
    %18 = arith.truncf %17 : vector<16x24xf32> to vector<16x24xbf16>
    %c0_8 = arith.constant 0 : index
    %c0_9 = arith.constant 0 : index
    %19 = vector.load %arg8[%c0_8, %c0_9] : memref<4x16xbf16, #tpu.memory_space<vmem>>, vector<4x16xbf16>
    %cst_10 = arith.constant dense<0.000000e+00> : vector<4x24xf32>
    %20 = tpu.matmul %19, %18, %cst_10 {dimension_numbers = #tpu.dot_dimension_numbers<[1], [0], [0], [1], [0, 0, 1, 1], [], []>} : vector<4x16xbf16>, vector<16x24xbf16>, vector<4x24xf32> -> vector<4x24xf32>
    %c0_11 = arith.constant 0 : index
    %c0_12 = arith.constant 0 : index
    %21 = vector.load %arg11[%c0_11, %c0_12] : memref<4x128xf32, #tpu.memory_space<vmem>>, vector<4x128xf32>
    %22 = arith.truncf %20 : vector<4x24xf32> to vector<4x24xbf16>
    %cst_13 = arith.constant dense<0.000000e+00> : vector<4x128xf32>
    %23 = tpu.matmul %22, %5, %cst_13 {dimension_numbers = #tpu.dot_dimension_numbers<[1], [0], [0], [1], [0, 0, 1, 1], [], []>} : vector<4x24xbf16>, vector<24x128xbf16>, vector<4x128xf32> -> vector<4x128xf32>
    %24 = arith.addf %21, %23 : vector<4x128xf32>
    %c0_14 = arith.constant 0 : index
    %c0_15 = arith.constant 0 : index
    %25 = vector.load %arg11[%c0_14, %c0_15] : memref<4x128xf32, #tpu.memory_space<vmem>>, vector<4x128xf32>
    tpu.vector_store %arg11[%c0_14, %c0_15], %24 {strides = array<i32>} : memref<4x128xf32, #tpu.memory_space<vmem>>, vector<4x128xf32>,
    %c2_i32 = arith.constant 2 : i32
    %26 = arith.cmpi eq, %arg1, %c2_i32 : i32
    %27 = arith.extui %26 : i1 to i32
    %c0_i32_16 = arith.constant 0 : i32
    %28 = arith.cmpi ne, %27, %c0_i32_16 : i32
    scf.if %28 {
      %c0_17 = arith.constant 0 : index
      %c0_18 = arith.constant 0 : index
      %29 = vector.load %arg11[%c0_17, %c0_18] : memref<4x128xf32, #tpu.memory_space<vmem>>, vector<4x128xf32>
      %30 = arith.truncf %29 : vector<4x128xf32> to vector<4x128xbf16>
      %c0_19 = arith.constant 0 : index
      %c0_20 = arith.constant 0 : index
      %31 = vector.load %arg6[%c0_19, %c0_20] : memref<128x128xbf16, #tpu.memory_space<vmem>>, vector<128x128xbf16>
      %cst_21 = arith.constant dense<0.000000e+00> : vector<4x128xf32>
      %32 = tpu.matmul %30, %31, %cst_21 {dimension_numbers = #tpu.dot_dimension_numbers<[1], [0], [0], [1], [0, 0, 1, 1], [], []>} : vector<4x128xbf16>, vector<128x128xbf16>, vector<4x128xf32> -> vector<4x128xf32>
      %c0_22 = arith.constant 0 : index
      %c0_23 = arith.constant 0 : index
      %33 = vector.load %arg7[%c0_22, %c0_23] : memref<1x128xf32, #tpu.memory_space<vmem>>, vector<1x128xf32>
      %34 = vector.broadcast %33 : vector<1x128xf32> to vector<4x128xf32>
      %35 = arith.addf %32, %34 : vector<4x128xf32>
      %c0_24 = arith.constant 0 : index
      %c0_25 = arith.constant 0 : index
      %c0_26 = arith.constant 0 : index
      %36 = vector.load %arg9[%c0_24, %c0_25, %c0_26] : memref<1x4x128xf32, #tpu.memory_space<vmem>>, vector<1x4x128xf32>
      %37 = vector.shape_cast %36 : vector<1x4x128xf32> to vector<4x128xf32>
      %38 = vector.shape_cast %35 : vector<4x128xf32> to vector<1x4x128xf32>
      tpu.vector_store %arg9[%c0_24, %c0_25, %c0_26], %38 {strides = array<i32>} : memref<1x4x128xf32, #tpu.memory_space<vmem>>, vector<1x4x128xf32>,
    } else {
    }
    return
  }
  func.func @transform_0(%arg0: i32, %arg1: i32) -> (i32, i32, i32) {
    %c0_i32 = arith.constant 0 : i32
    %c0_i32_0 = arith.constant 0 : i32
    %c0_i32_1 = arith.constant 0 : i32
    return %arg0, %c0_i32, %c0_i32_0 : i32, i32, i32
  }
  func.func @transform_1(%arg0: i32, %arg1: i32) -> (i32, i32, i32, i32) {
    %c0_i32 = arith.constant 0 : i32
    %c0_i32_0 = arith.constant 0 : i32
    %c0_i32_1 = arith.constant 0 : i32
    return %arg0, %arg1, %c0_i32, %c0_i32_0 : i32, i32, i32, i32
  }
  func.func @transform_2(%arg0: i32, %arg1: i32) -> (i32, i32) {
    %c0_i32 = arith.constant 0 : i32
    %c0_i32_0 = arith.constant 0 : i32
    %c0_i32_1 = arith.constant 0 : i32
    return %c0_i32, %c0_i32_0 : i32, i32
  }
  func.func @transform_3(%arg0: i32, %arg1: i32) -> (i32, i32) {
    %c0_i32 = arith.constant 0 : i32
    %c0_i32_0 = arith.constant 0 : i32
    %c0_i32_1 = arith.constant 0 : i32
    return %c0_i32, %c0_i32_0 : i32, i32
  }
  func.func @transform_4(%arg0: i32, %arg1: i32) -> (i32, i32) {
    %c0_i32 = arith.constant 0 : i32
    %c0_i32_0 = arith.constant 0 : i32
    %c0_i32_1 = arith.constant 0 : i32
    return %c0_i32, %c0_i32_0 : i32, i32
  }
  func.func @transform_5(%arg0: i32, %arg1: i32) -> (i32, i32) {
    %c0_i32 = arith.constant 0 : i32
    %c0_i32_0 = arith.constant 0 : i32
    %c0_i32_1 = arith.constant 0 : i32
    return %c0_i32, %c0_i32_0 : i32, i32
  }
  func.func @transform_6(%arg0: i32, %arg1: i32) -> (i32, i32) {
    %c0_i32 = arith.constant 0 : i32
    %c0_i32_0 = arith.constant 0 : i32
    %c0_i32_1 = arith.constant 0 : i32
    return %c0_i32, %c0_i32_0 : i32, i32
  }
  func.func @transform_7(%arg0: i32, %arg1: i32) -> (i32, i32, i32) {
    %c0_i32 = arith.constant 0 : i32
    %c0_i32_0 = arith.constant 0 : i32
    %c0_i32_1 = arith.constant 0 : i32
    return %arg0, %c0_i32, %c0_i32_0 : i32, i32, i32
  }
}

</mosaic_0001>

<bundles_post_ra>
// kernel: tpu_custom_call.1
= control target key start
LH: loop header
LB: loop body
LE: loop exit
PB: predicated region body
PF: predicated region fallthrough
CT: control target
= control target key end

     0   :  { %s1646_s0 = inlined_call_operand.hbm [shape: f32[2,16,128], index: 0, kind: input, shape index: {}]   ;;  %s1647_s1 = inlined_call_operand.hbm [shape: f32[2,3,24,128], index: 1, kind: input, shape index: {}]   ;;  %s1648_s2 = inlined_call_operand.hbm [shape: bf16[128,128], index: 2, kind: input, shape index: {}]   ;;  %s1649_s3 = inlined_call_operand.vmem [shape: f32[1,128], index: 3, kind: input, shape index: {}]   ;;  %s1650_s4 = inlined_call_operand.hbm [shape: bf16[128,128], index: 4, kind: input, shape index: {}]   ;;  %s1651_s5 = inlined_call_operand.vmem [shape: f32[1,128], index: 5, kind: input, shape index: {}]   ;;  %s1652_s6 = inlined_call_operand.vmem [shape: bf16[4,16], index: 6, kind: input, shape index: {}]   ;;  %s1653_s7 = inlined_call_operand.hbm [shape: f32[2,4,128], index: 7, kind: output, shape index: {}]  }
   0x1   :  { %1666 = sst [smem:[#allocation27_spill]] %s1646_s0 }
   0x2   :  { %1667 = sst [smem:[#allocation28_spill]] %s1648_s2 }
   0x3   :  { %1668 = sst [smem:[#allocation29_spill]] %s1649_s3 }
   0x4   :  { %1669 = sst [smem:[#allocation30_spill]] %s1650_s4 }
   0x5   :  { %1670 = sst [smem:[#allocation31_spill]] %s1651_s5 }
   0x6   :  { %1671 = sst [smem:[#allocation32_spill]] %s1652_s6 }
   0x7   :  { %1672 = sst [smem:[#allocation33_spill]] %s1653_s7 }
   0x8   :  { %12 = vsyncpa [#allocation5], 0 }
   0x9   :  { %14 = vsyncpa [#allocation5 + $0x1], 0 }
   0xa   :  { %15 = vsyncpa [#allocation8], 0 }
   0xb   :  { %17 = vsyncpa [#allocation8 + $0x1], 0 }
   0xc   :  { %18 = vsyncpa [#allocation11], 0 }
   0xd   :  { %19 = vsyncpa [#allocation6], 0 }
   0xe   :  { %21 = vsyncpa [#allocation6 + $0x1], 0  ;;  %s1372_s24 = smov 0   ;;  %s1374_s25 = smov 0  }
   0xf   :  { %s1376_s26 = smov 0   ;;  %s1378_s27 = smov 0  }
  0x10   :  { %s1380_s28 = smov 0   ;;  %s1382_s29 = smov 0  }
  0x11   :  { %s1384_s30 = smov 0   ;;  %s1386_s8 = smov 0  }
  0x12   :  { %s1388_s9 = smov 0   ;;  %s1390_s10 = smov 0  }
  0x13   :  { %s1392_s11 = smov 0  }
  0x14 LB: > { %1673 = sst [smem:[#allocation18_spill]] %s1295_s27  ;;  %s1426_s12 = sadd.s32 4294967295, %s1323_s11   ;;  %s1323_s11 = sphi %s1392_s11, %s27_s11   ;;  %s1319_s10 = sphi %s1390_s10, %s1718_s10   ;;  %s1315_s9 = sphi %s1388_s9, %s1717_s9   ;;  %s1311_s8 = sphi %s1386_s8, %s1716_s8   ;;  %s1307_s30 = sphi %s1384_s30, %s1707_s30   ;;  %s1303_s29 = sphi %s1382_s29, %s1715_s29   ;;  %s1299_s28 = sphi %s1380_s28, %s1714_s28   ;;  %s1295_s27 = sphi %s1378_s27, %s1713_s27   ;;  %s1291_s26 = sphi %s1376_s26, %s1712_s26   ;;  %s1287_s25 = sphi %s1374_s25, %s1711_s25   ;;  %s1283_s24 = sphi %s1372_s24, %s1710_s24  }
  0x15   : > { %1674 = sst [smem:[#allocation19_spill]] %s1307_s30  ;;  %p87_p0 = scmp.ne.s32.totalorder %s1287_s25, %s1283_s24 }
  0x16   : > { %1675 = sst [smem:[#allocation20_spill]] %s1311_s8  ;;  %p60_p1 = scmp.eq.s32.totalorder %s1426_s12, 0 }
  0x17   : > { %1676 = sst [smem:[#allocation21_spill]] %s1315_s9  ;;  %p216_p2 = scmp.eq.s32.totalorder %s1426_s12, 5 }
  0x18   : > { %1677 = sst [smem:[#allocation22_spill]] %s1323_s11  ;;  %p810_p3 = scmp.ge.s32.totalorder %s1323_s11, 1 }
  0x19   : > { %p229_p4 = scmp.lt.s32.totalorder %s1323_s11, 7  ;;  %p1435_p5 = por %p87_p0, %p60_p1 }
  0x1a   : > { %s1680_s2 = sld [smem:[#allocation28_spill]]  ;;  %s1325_s18 = smov [#allocation9]  }
  0x1b   : > { %p1439_p6 = pnand %p810_p3, %p229_p4  ;;  %s242_s19 = sshll.u32 %s1325_s18, 4  ;;  %s243_s19 = int_to_ptr.vmem [resolvable:$true] %s242_s19 }
  0x1c   : > { %s1681_s4 = sld [smem:[#allocation30_spill]]  ;;  %s1326_s23 = smov 64  }
  0x1d   : > { %p940_p7 = pneg %p1439_p6  ;;  %s1327_s24 = smov 4  }
  0x1e   : > { %s1328_s15 = smov [#allocation10]   ;;  %s809_s18 = sadd.s32 4294967294, %s1323_s11  }
  0x1f   : > { %p941_p8 = pnand %p940_p7, %p60_p1  ;;  %s259_s16 = sshll.u32 %s1328_s15, 4  ;;  %s260_s16 = int_to_ptr.vmem [resolvable:$true] %s259_s16 }
  0x20   : > { %s240_s17 = sshll.u32 %s1680_s2, 4  ;;  %p53_p9 = scmp.ne.s32.totalorder %s1303_s29, %s1299_s28  ;;  %s241_s17 = int_to_ptr.hbm [resolvable:$true] %s240_s17 }
  0x21   : > { %943 = dma.hbm_to_vmem [thread:$0]  (!%p941_p8), %s241_s17, 1024, %s243_s19, [#allocation8], %s1326_s23, %s1326_s23, %s1327_s24  }
  0x22   : > { %s257_s22 = sshll.u32 %s1681_s4, 4  ;;  %p54_p10 = scmp.eq.s32.totalorder %s1323_s11, 0  ;;  %s258_s22 = int_to_ptr.hbm [resolvable:$true] %s257_s22 }
  0x23   : > { %946 = dma.hbm_to_vmem [thread:$0]  (!%p941_p8), %s258_s22, 1024, %s260_s16, [#allocation11], %s1326_s23, %s1326_s23, %s1327_s24  }
  0x24   : > { %p59_p11 = scmp.ne.s32.totalorder %s1299_s28, %s1295_s27  ;;  %p222_p12 = scmp.eq.s32.totalorder %s809_s18, 5 }
  0x25   : > { %p1463_p13 = por %p54_p10, %p53_p9  ;;  %p1469_p0 = por %p216_p2, %p53_p9 }
  0x26   : > { %p1475_p3 = por %p60_p1, %p59_p11  ;;  %p1479_p4 = por %p222_p12, %p59_p11 }
  0x27   : > { %s1683_s17 = scalar_select %p1469_p0, 1, 0 }
  0x28   : > { %s1686_s21 = scalar_select %p1479_p4, 1, 0 }
  0x29   : > { %1684 = sst [smem:[#allocation23_spill]] %s1683_s17  ;;  %p960_p7 = scmp.lt.s32.totalorder %s1323_s11, 6 }
  0x2a   : > { %1687 = sst [smem:[#allocation24_spill]] %s1686_s21  ;;  %s279_s22 = sand.u32 1, %s1303_s29  }
  0x2b   : > { %s814_s23 = sshll.u32 %s279_s22, 4  ;;  %s899_s24 = sshll.u32 %s1319_s10, 4 }
  0x2c   : > { %s1688_s0 = sld [smem:[#allocation27_spill]]  ;;  %s283_s7 = scalar_lea.vmem [#allocation4], %s814_s23 }
  0x2d   : > { %s291_s2 = sshll.u32 %s283_s7, 4  ;;  %p948_p2 = pnand %p960_p7, %p1463_p13  ;;  %s292_s2 = int_to_ptr.vmem [resolvable:$true] %s291_s2 }
  0x2e   : > { %s280_s21 = scalar_lea.sflag [#allocation5], %s279_s22  ;;  %s1657_s27 = smov 128  }
  0x2f   : > { %s1658_s15 = smov 8   ;;  %s74_s7 = sadd.s32 1, %s1291_s26 }
  0x30   : > { %s36_s23 = sadd.s32 1, %s1315_s9  ;;  %p81_p8 = scmp.ne.s32.totalorder %s1291_s26, %s1287_s25 }
  0x31   : > { %p37_p9 = scmp.ge.s32.totalorder %s36_s23, 3  ;;  %s1690_s20 = sadd.s32 1, %s1319_s10 }
  0x32   : > { %s288_s18 = scalar_lea.hbm %s1688_s0, %s899_s24  ;;  %s301_s24 = sand.u32 1, %s1323_s11  }
  0x33   : > { %s289_s4 = sshll.u32 %s288_s18, 4  ;;  %p83_p11 = por %p81_p8, %p54_p10  ;;  %s290_s4 = int_to_ptr.hbm [resolvable:$true] %s289_s4 }
  0x34   : > { %950 = dma.hbm_to_vmem [thread:$0]  (!%p948_p2), %s290_s4, 256, %s292_s2, %s280_s21, %s1657_s27, %s1657_s27, %s1658_s15  }
  0x35   : > { %s1720_s23 = smov (%p37_p9, %s36_s23), 0  ;;  %s1722_s20 = smov (!%p37_p9, %s1690_s20), %s1319_s10 }
  0x36   : > { %1689 = sst [smem:[#allocation25_spill]] %s1720_s23  ;;  %s70_s22 = ssub.s32 %s1315_s9, %s1720_s23 }
  0x37   : > { %s303_s16 = sand.u32 1, %s1291_s26   ;;  %p41_p12 = scmp.ge.s32.totalorder %s1722_s20, 2 }
  0x38   : > { %s922_s2 = smul.u32 24, %s303_s16  ;;  %p1514_p13 = pnand %p960_p7, %p83_p11 }
  0x39   : > { %s923_s4 = smul.u32 3, %s1315_s9  ;;  %s1724_s20 = smov (%p41_p12, %s1722_s20), 0 }
  0x3a   : > { %1692 = sst [smem:[#allocation26_spill]] %s1724_s20  ;;  %s924_s18 = smul.u32 9, %s1319_s10 }
  0x3b   : > { %s43_s27 = ssub.s32 %s1319_s10, %s1724_s20  ;;  %s305_s15 = scalar_lea.vmem [#allocation7], %s922_s2 }
  0x3c   : > { %s315_s0 = sshll.u32 %s305_s15, 4  ;;  %p44_p10 = scmp.eq.s32.totalorder %s43_s27, 0  ;;  %s316_s0 = int_to_ptr.vmem [resolvable:$true] %s315_s0 }
  0x3d   : > { %s71_s23 = sor.u32 %s70_s22, %s43_s27  ;;  %s310_s17 = sadd.s32 %s924_s18, %s923_s4 }
  0x3e   : > { %p72_p2 = scmp.eq.s32.totalorder %s71_s23, 0  ;;  %s1693_s8 = sadd.s32 1, %s1303_s29 }
  0x3f   : > { %s1526_s16 = scalar_select %p44_p10, %s1303_s29, %s1693_s8  }
  0x40   : > { %s1529_s9 = scalar_select %p72_p2, %s1291_s26, %s74_s7  }
  0x41   : > { %s817_s11 = sshll.u32 %s310_s17, 3  ;;  %s302_s20 = scalar_lea.sflag [#allocation8], %s301_s24 }
  0x42   : > { %s312_s3 = scalar_lea.hbm %s1647_s1, %s817_s11  ;;  %s1694_s15 = smov 8  }
  0x43   : > { %s313_s30 = sshll.u32 %s312_s3, 4  ;;  %s1695_s2 = smov 128   ;;  %s314_s30 = int_to_ptr.hbm [resolvable:$true] %s313_s30 }
  0x44   : > { %953 = dma.hbm_to_vmem [thread:$0]  (!%p1514_p13), %s314_s30, 384, %s316_s0, %s302_s20, %s1695_s2, %s1695_s2, %s1694_s15  }
  0x45   : > { %327 = sbr.rel (%p1439_p6) target bundleno = 1134 (0x46e), region = 48  ;;  %s1542_s27 = sand.u32 (!%p1439_p6), 1, %s1299_s28  }
  0x46   : > { %s819_s8 = sshll.u32 (!%p1439_p6), %s1542_s27, 4  ;;  %s330_s5 = scalar_lea.sflag (!%p1439_p6), [#allocation5], %s1542_s27 }
  0x47   : > { %s1546_s6 = scalar_lea.vmem (!%p1439_p6), [#allocation4], %s819_s8 }
  0x4a   : > { %1262 = dma.done.wait (%p1475_p3), %s330_s5, 256  }
  0x4b   : > { %1264 = vsyncadd (%p1475_p3), %s330_s5, 4294967040  ;;  %s339_s0 = sand.u32 1, %s1426_s12   ;;  %s341_s3 = sand.u32 1, %s1287_s25  }
  0x4c   : > { %s925_s30 = smul.u32 24, %s341_s3  ;;  %s340_s11 = scalar_lea.sflag [#allocation8], %s339_s0 }
  0x4e   : > { %s1554_s14 = scalar_lea.vmem [#allocation7], %s925_s30 }
  0x4f   : > { %1266 = dma.done.wait (%p1435_p5), %s340_s11, 384  }
  0x50   : > { %1268 = vsyncadd (%p1435_p5), %s340_s11, 4294966912 }
  0x51   : > { %1270 = dma.done.wait (%p60_p1), [#allocation8], 1024  }
  0x52   : > { %1272 = vsyncadd (%p60_p1), [#allocation8], 4294966272 }
  0x53   : > { %1274 = dma.done.wait (%p60_p1), [#allocation11], 1024  }
  0x54   : > { %1276 = vsyncadd (%p60_p1), [#allocation11], 4294966272  ;;  %s822_s17 = sshll.u32 %s1542_s27, 2  ;;  %s1696_s7 = sld [smem:[#allocation19_spill]] }
  0x55   : > { %s1569_s19 = scalar_lea.vmem [#allocation12], %s822_s17 }
  0x5a   : > { %p823_p6 = scmp.ne.s32.totalorder %s1696_s7, 0 }
  0x5b   : > { %s1697_s23 = sld [smem:[#allocation29_spill]] (!%p823_p6) }
  0x5c   : > { %394 = sbr.rel (%p823_p6) target bundleno = 268 (0x10c), region = 68 }
  0x61   : > { %v907_v0 = vld [vmem:[#allocation9 + $0x38] sm:$0xff]  ;;  %v1331_v1 = vmov 0.0   ;;  %v906_v2 = vld [vmem:[#allocation9 + $0x30] sm:$0xff]  ;;  %v905_v3 = vld [vmem:[#allocation9 + $0x28] sm:$0xff] }
  0x62   : > { %395 = vst [vmem:[#allocation3] sm:$0xf] %v1331_v1  ;;  %467 = vmatpush.bf16.msra.mxu0 %v907_v0  ;;  %v904_v4 = vld [vmem:[#allocation9 + $0x20] sm:$0xff]  ;;  %v903_v5 = vld [vmem:[#allocation9 + $0x18] sm:$0xff]  ;;  %v902_v6 = vld [vmem:[#allocation9 + $0x10] sm:$0xff] }
  0x63   : > { %v901_v7 = vld [vmem:[#allocation9 + $0x8] sm:$0xff]  ;;  %v900_v8 = vld [vmem:[#allocation9] sm:$0xff] }
  0x64   : > { %v396_v9 = vld [vmem:[%s1546_s6] sm:$0xff]  ;;  %v397_v10 = vld [vmem:[%s1546_s6 + $0x8] sm:$0xff] }
  0x65   : > { %v398_v11 = vpack.c.bf16 %v397_v10, %v396_v9  ;;  %v1059_v13 = vld [vmem:[%s1697_s23] ss:$0 sm:$0xff] }
  0x66   : > { %468 = vmatpush.bf16.msra.mxu0 %v906_v2 }
  0x6a   : > { %469 = vmatpush.bf16.msra.mxu0 %v905_v3 }
  0x6e   : > { %470 = vmatpush.bf16.msra.mxu0 %v904_v4 }
  0x72   : > { %471 = vmatpush.bf16.msra.mxu0 %v903_v5 }
  0x76   : > { %472 = vmatpush.bf16.msra.mxu0 %v902_v6 }
  0x7a   : > { %473 = vmatpush.bf16.msra.mxu0 %v901_v7 }
  0x7e   : > { %474 = vmatpush.bf16.msra.mxu0 %v900_v8 }
  0x81   : > { %475 = vmatmul.bf16.vlgmr.msra.gmra.mxu0 %v398_v11 }
  0xfe   : > { %v476_v12 = vpop.f32.mrf.mxu0 }
  0xff   : > { %v477_v15 = vadd.f32 %v1059_v13, %v476_v12 }
 0x106   : > { %v478_v14 = vpop.f32.mrf.mxu0 }
 0x107   : > { %v479_v16 = vadd.f32 %v1059_v13, %v478_v14 }
 0x109   : > { %v920_v17 = vpack.c.bf16 %v479_v16, %v477_v15 }
 0x10b   : > { %921 = vst [vmem:[#allocation2] sm:$0xff] %v920_v17  }
 0x10c PF: > { %v487_v18 = vld [vmem:[%s1554_s14 + $0x10] sm:$0xff]  ;;  %v485_v20 = vld [vmem:[%s1554_s14] sm:$0xff]  ;;  %v486_v21 = vld [vmem:[%s1554_s14 + $0x8] sm:$0xff]  ;;  %vm512_vm0 = vcmask 195584   ;;  %vm559_vm1 = vcmask 1043456   ;;  %s1698_s22 = sld [smem:[#allocation32_spill]] }
 0x10d   : > { %v489_v19 = vpack.c.bf16 %v487_v18, %v487_v18  ;;  %v488_v22 = vpack.c.bf16 %v486_v21, %v485_v20  ;;  %vm537_vm2 = vcmask 130048   ;;  %v554_v50 = vld [vmem:[#allocation3] sm:$0xf]  ;;  %s1699_s4 = sld [smem:[#allocation19_spill]] }
 0x10f   : > { %504 = vmatpush.bf16.xpose.msra.mxu0 %v489_v19  ;;  %v561_v38 = vsel %vm559_vm1, %v489_v19, 0 }
 0x110   : > { %569 = vmatpush.bf16.msra.mxu2 %v561_v38 }
 0x112   : > { %v908_v23 = vld [vmem:[#allocation2] sm:$0xff] }
 0x113   : > { %v536_v46 = vld [vmem:[%s1698_s22] sm:$0x3]  ;;  %p862_p1 = scmp.ne.s32.totalorder %s1699_s4, 2 }
 0x114   : > { %570 = vmatpush.bf16.msra.mxu2 %v488_v22  ;;  %s1700_s15 = sld [smem:[#allocation31_spill]] (!%p862_p1) }
 0x117   : > { %505 = vmatpush.bf16.xpose.msra.mxu0 %v488_v22 }
 0x11e   : > { %506 = vmatmul.bf16.vlgmr.msra.gmra.mxu0 %v908_v23 }
 0x19b   : > { %v507_v24 = vpop.f32.mrf.mxu0 }
 0x19c   : > { %v513_v25 = vsel %vm512_vm0, %v507_v24, -inf }
 0x19d   : > { %514 = vmax.xlane.f32.xlu0 %v513_v25 }
 0x1a3   : > { %v509_v26 = vpop.f32.mrf.mxu0 }
 0x1a4   : > { %v516_v27 = vsel %vm512_vm0, %v509_v26, -inf }
 0x1a5   : > { %517 = vmax.xlane.f32.xlu0 %v516_v27 }
 0x210   : > { %v515_v28 = vpop.xlane.xlu0 %514 }
 0x211   : > { %v519_v29 = vsub.f32 %v507_v24, %v515_v28 }
 0x213   : > { %v521_v30 = vmul.f32 1.442695, %v519_v29 }
 0x215   : > { %1060 = vpow2.f32 %v521_v30 }
 0x218   : > { %v518_v31 = vpop.xlane.xlu0 %517 }
 0x219   : > { %v520_v32 = vsub.f32 %v509_v26, %v518_v31 }
 0x21b   : > { %v1061_v33 = vpop.eup %1060  ;;  %v523_v34 = vmul.f32 1.442695, %v520_v32 }
 0x21c   : > { %v525_v35 = vsel %vm512_vm0, %v1061_v33, 0.0 }
 0x21d   : > { %1062 = vpow2.f32 %v523_v34  ;;  %526 = vadd.xlane.f32.xlu1 %v525_v35 }
 0x223   : > { %v1063_v36 = vpop.eup %1062 }
 0x224   : > { %v528_v37 = vsel %vm512_vm0, %v1063_v36, 0.0 }
 0x225   : > { %529 = vadd.xlane.f32.xlu1 %v528_v37 }
 0x290   : > { %v527_v39 = vpop.xlane.xlu1 %526 }
 0x291   : > { %1064 = vrcp.f32 %v527_v39 }
 0x297   : > { %v1065_v41 = vpop.eup %1064 }
 0x298   : > { %v530_v40 = vpop.xlane.xlu1 %529  ;;  %v533_v43 = vmul.f32 %v1065_v41, %v1061_v33 }
 0x299   : > { %1066 = vrcp.f32 %v530_v40 }
 0x29f   : > { %v1067_v42 = vpop.eup %1066 }
 0x2a0   : > { %v534_v44 = vmul.f32 %v1067_v42, %v1063_v36 }
 0x2a2   : > { %v535_v45 = vpack.c.bf16 %v534_v44, %v533_v43 }
 0x2a4   : > { %548 = vmatpush.bf16.msra.mxu1 %v535_v45 }
 0x2a7   : > { %860 = vmatmul.msk.bf16.vlgmr.msra.gmra.mxu1 %vm537_vm2, %v536_v46 }
 0x324   : > { %v550_v47 = vpop.f32.mrf.mxu1 }
 0x325   : > { %v555_v48 = vpack.c.bf16 %v550_v47, %v550_v47 }
 0x327   : > { %861 = vmatmul.msk.bf16.vlgmr.msra.gmra.mxu2 %vm512_vm0, %v555_v48 }
 0x32c   : > { %v552_v49 = vpop.f32.mrf.mxu1 }
 0x3aa   : > { %v572_v51 = vpop.f32.mrf.mxu2 }
 0x3ab   : > { %v576_v52 = vadd.f32 %v572_v51, %v554_v50 }
 0x3ad   : > { %577 = vst [vmem:[#allocation3] sm:$0xf] %v576_v52 }
 0x3ae   : > { %581 = sbr.rel (%p862_p1) target bundleno = 1113 (0x459), region = 72 }
 0x3b2   : > { %v574_v53 = vpop.f32.mrf.mxu2 }
 0x3b3   : > { %v916_v54 = vld [vmem:[#allocation10 + $0x38] sm:$0xff]  ;;  %v915_v55 = vld [vmem:[#allocation10 + $0x30] sm:$0xff]  ;;  %v914_v56 = vld [vmem:[#allocation10 + $0x28] sm:$0xff] }
 0x3b4   : > { %652 = vmatpush.bf16.msra.mxu0 %v916_v54  ;;  %v913_v57 = vld [vmem:[#allocation10 + $0x20] sm:$0xff]  ;;  %v912_v58 = vld [vmem:[#allocation10 + $0x18] sm:$0xff]  ;;  %v911_v59 = vld [vmem:[#allocation10 + $0x10] sm:$0xff] }
 0x3b5   : > { %v910_v60 = vld [vmem:[#allocation10 + $0x8] sm:$0xff]  ;;  %v909_v61 = vld [vmem:[#allocation10] sm:$0xff] }
 0x3b6   : > { %v582_v62 = vld [vmem:[#allocation3] sm:$0xf]  ;;  %v1068_v0 = vld [vmem:[%s1700_s15] ss:$0 sm:$0xff] }
 0x3b7   : > { %v583_v63 = vpack.c.bf16 %v582_v62, %v582_v62 }
 0x3b8   : > { %653 = vmatpush.bf16.msra.mxu0 %v915_v55 }
 0x3bc   : > { %654 = vmatpush.bf16.msra.mxu0 %v914_v56 }
 0x3c0   : > { %655 = vmatpush.bf16.msra.mxu0 %v913_v57 }
 0x3c4   : > { %656 = vmatpush.bf16.msra.mxu0 %v912_v58 }
 0x3c8   : > { %657 = vmatpush.bf16.msra.mxu0 %v911_v59 }
 0x3cc   : > { %658 = vmatpush.bf16.msra.mxu0 %v910_v60 }
 0x3d0   : > { %659 = vmatpush.bf16.msra.mxu0 %v909_v61 }
 0x3d3   : > { %660 = vmatmul.bf16.vlgmr.msra.gmra.mxu0 %v583_v63 }
 0x450   : > { %v661_v1 = vpop.f32.mrf.mxu0 }
 0x451   : > { %v662_v2 = vadd.f32 %v1068_v0, %v661_v1 }
 0x453   : > { %665 = vst [vmem:[%s1569_s19] sm:$0xf] %v662_v2 }
 0x458   : > { %v663_v3 = vpop.f32.mrf.mxu0 }
 0x459 PF: > { %s1701_s2 = sld [smem:[#allocation20_spill]]  ;;  %s679_s11 = sshll.u32 %s1569_s19, 4  ;;  %s680_s11 = int_to_ptr.vmem [resolvable:$true] %s679_s11 }
 0x45a   : > { %s1703_s3 = sld [smem:[#allocation33_spill]]  ;;  %s667_s17 = scalar_lea.sflag [#allocation6], %s1542_s27 }
 0x45f   : > { %s896_s5 = sshll.u32 %s1701_s2, 2 }
 0x460   : > { %s677_s30 = scalar_lea.hbm %s1703_s3, %s896_s5  ;;  %s1209_s24 = scalar_lea.hbm %s1703_s3, 8 }
 0x461   : > { %s681_s14 = sshll.u32 %s677_s30, 4  ;;  %s682_s14 = int_to_ptr.hbm [resolvable:$true] %s681_s14 }
 0x462   : > { %s1203_s7 = sshra.s32 %s682_s14, 4  ;;  %s1204_s7 = int_to_ptr.hbm [resolvable:$true] %s1203_s7 }
 0x463   : > { %s1205_s12 = scalar_lea.hbm %s1204_s7, 4  ;;  %p1210_p8 = scmp.lt.s32.totalorder %s1204_s7, %s1703_s3 }
 0x464   : > { %p1206_p5 = scmp.ne.s32.totalorder %s1204_s7, %s1205_s12  ;;  %p1211_p9 = scmp.lt.s32.totalorder %s1209_s24, %s1205_s12 }
 0x466   : > { %p1207_p3 = pnand %p1206_p5, %p1469_p0  ;;  %p1212_p11 = por %p1211_p9, %p1210_p8 }
 0x468   : > { %p1208_p7 = pneg %p1207_p3 }
 0x46a   : > { %p1213_p12 = pnand %p1212_p11, %p1208_p7 }
 0x46c   : > { %1216 = shalt.err (!%p1213_p12)
}
 0x46d   : > { %938 = dma.vmem_to_hbm [thread:$0]  (%p1469_p0), %s680_s11, 64, %s682_s14, %s667_s17  }
 0x46e PF: > { %s1704_s27 = sld [smem:[#allocation22_spill]] }
 0x46f   : > { %s1705_s19 = sld [smem:[#allocation18_spill]] }
 0x474   : > { %p963_p13 = scmp.ge.s32.totalorder %s1704_s27, 2 }
 0x475   : > { %s693_s21 = sand.u32 1, %s1705_s19  }
 0x476   : > { %p955_p10 = pnand %p963_p13, %p1479_p4  ;;  %s694_s18 = scalar_lea.sflag [#allocation6], %s693_s21 }
 0x478   : > { %p956_p2 = pneg %p955_p10 }
 0x47a   : > { %1278 = dma.done.wait (%p956_p2), %s694_s18, 64  }
 0x47b   : > { %1280 = vsyncadd (%p956_p2), %s694_s18, 4294967232  ;;  %s27_s11 = sadd.s32 1, %s1704_s27   ;;  %s1707_s30 = sld [smem:[#allocation21_spill]] }
 0x47c   : > { %p24_p6 = scmp.ge.s32.totalorder %s27_s11, 8   ;;  %s1708_s15 = sld [smem:[#allocation25_spill]] }
 0x47d   : > { %s1709_s2 = sld [smem:[#allocation26_spill]]  ;;  %s1710_s24 = smov %s1287_s25 }
 0x47e   : > { %s1711_s25 = smov %s1291_s26  ;;  %s1712_s26 = smov %s1529_s9 }
 0x47f   : > { %s1713_s27 = smov %s1299_s28  ;;  %s1714_s28 = smov %s1303_s29 }
 0x480   : > { %s1715_s29 = smov %s1526_s16  ;;  %s1716_s8 = smov %s1319_s10 }
 0x481   :  { %26 = sbr.rel (!%p24_p6) target bundleno = 20 (0x14), region = 122 }
 0x482   : > { %s1717_s9 = smov %s1708_s15 }
 0x483   : > { %s1718_s10 = smov %s1709_s2 }
 0x486   :  { %700 = vsyncpa [#allocation5], 1 }
 0x487   :  { %702 = vsyncpa [#allocation5 + $0x1], 1 }
 0x488   :  { %703 = vsyncpa [#allocation8], 1 }
 0x489   :  { %705 = vsyncpa [#allocation8 + $0x1], 1 }
 0x48a   :  { %706 = vsyncpa [#allocation11], 1 }
 0x48b   :  { %707 = vsyncpa [#allocation6], 1 }
 0x48c   :  { %709 = vsyncpa [#allocation6 + $0x1], 1 }

</bundles_post_ra>
